<compile_context>
chip_gen: v7x
topology: tpu7x:2x2x1
jax: 0.10.0
libtpu: 0.0.40
codegen_flags: <defaults>
</compile_context>

<pallas_src>
import functools

import jax
import jax.numpy as jnp
from jax.experimental import pallas as pl
from jax.experimental.pallas import tpu as pltpu


def _round_up(x, m):
    return (x + m - 1) // m * m


def _probe_roll_direction():
    """pltpu.roll is specified to match jnp.roll; verify once (eagerly) so the
    im2col shift sign is robust to any convention difference."""
    def k(x_ref, o_ref):
        o_ref[...] = pltpu.roll(x_ref[...], 1, axis=1)
    x = jnp.arange(8 * 128, dtype=jnp.float32).reshape(8, 128)
    y = pl.pallas_call(k, out_shape=jax.ShapeDtypeStruct((8, 128), jnp.float32))(x)
    return bool(jnp.array_equal(y, jnp.roll(x, 1, axis=1)))


def _down_kernel(x_ref, w1_ref, p1_ref, w2_ref, p2_ref, o_ref, *,
                 vol, groups, cpg1, cpg2, eps, roll_like_jnp):
    # x_ref:  (1, C_in_pad, DHW)  bf16, pooled activation (padded channels = 0)
    # w1_ref: (3, C_mid_pad, 9*C_in_pad)  bf16, column = (kh*3+kw)*C_in_pad + ci
    # p1_ref: (C_mid_pad, 3)  f32 columns = [conv bias, GN gamma, GN beta]
    # w2_ref: (3, C_out_pad, 9*C_mid_pad) bf16
    # p2_ref: (C_out_pad, 3)
    # o_ref:  (1, C_out_pad, DHW) f32
    D, H, W = vol
    hw = H * W
    dhw = D * hw

    # ---- in-kernel tap validity masks ("virtual" zero padding), built once --
    lin = jax.lax.broadcasted_iota(jnp.int32, (1, dhw), 1)
    d_i = lin // hw
    rem = lin - d_i * hw
    h_i = rem // W
    w_i = rem - h_i * W

    def tap_mask(dd, dh, dw):
        conds = []
        if dd < 0: conds.append(d_i >= -dd)
        if dd > 0: conds.append(d_i < D - dd)
        if dh < 0: conds.append(h_i >= -dh)
        if dh > 0: conds.append(h_i < H - dh)
        if dw < 0: conds.append(w_i >= -dw)
        if dw > 0: conds.append(w_i < W - dw)
        if not conds:
            return None                                    # centre tap
        m = conds[0]
        for c in conds[1:]:
            m = jnp.logical_and(m, c)
        return m.astype(jnp.float32).astype(jnp.bfloat16)  # (1, dhw) of 0/1

    masks = {(kd, kh, kw): tap_mask(kd - 1, kh - 1, kw - 1)
             for kd in range(3) for kh in range(3) for kw in range(3)}

    def conv_gn_relu(act_f32, w_ref, p_ref, cpg):
        c_out = w_ref.shape[1]
        act_bf = act_f32.astype(jnp.bfloat16)

        # ---- conv: roll/mask im2col + 3 accumulated MXU matmuls (per kd) ----
        acc = None
        for kd in range(3):
            taps = []
            for kh in range(3):
                for kw in range(3):
                    dd, dh, dw = kd - 1, kh - 1, kw - 1
                    off = dd * hw + dh * W + dw
                    if off == 0:
                        taps.append(act_bf)
                        continue
                    sh = (-off) % dhw if roll_like_jnp else off % dhw
                    t = pltpu.roll(act_f32, sh, axis=1).astype(jnp.bfloat16)
                    taps.append(t * masks[(kd, kh, kw)])
            patches = jnp.concatenate(taps, axis=0)         # (9*C_in_pad, dhw) bf16
            part = jnp.dot(w_ref[kd], patches,
                           preferred_element_type=jnp.float32)
            acc = part if acc is None else acc + part       # (c_out, dhw) f32

        # ---- GroupNorm (two-pass, conv bias folded into stats) + ReLU ------
        bias  = p_ref[:, 0:1]
        gamma = p_ref[:, 1:2]
        beta  = p_ref[:, 2:3]
        inv_cnt = 1.0 / (cpg * dhw)

        ch = jax.lax.broadcasted_iota(jnp.int32, (c_out, 1), 0)
        grp = ch // cpg                         # padded channels map to >= groups
        sels = [(grp == g).astype(jnp.float32) for g in range(groups)]

        # per-channel sums (lane reduce), bias folded in analytically
        s1 = jnp.sum(acc, axis=1, keepdims=True) + dhw * bias
        mu = jnp.zeros((c_out, 1), jnp.float32)
        for sel in sels:                        # tiny (c_out,1) column ops only
            mu = mu + sel * (jnp.sum(s1 * sel, axis=0, keepdims=True) * inv_cnt)

        center = mu - bias                      # acc - center == (conv+bias) - mu
        diff = acc - center
        s2 = jnp.sum(diff * diff, axis=1, keepdims=True)
        var = jnp.zeros((c_out, 1), jnp.float32)
        for sel in sels:
            var = var + sel * (jnp.sum(s2 * sel, axis=0, keepdims=True) * inv_cnt)

        scale = gamma * jax.lax.rsqrt(var + eps)
        shift = beta - center * scale
        return jnp.maximum(acc * scale + shift, 0.0)        # single FMA pass

    pooled = x_ref[0].astype(jnp.float32)                   # (C_in_pad, dhw)
    y1 = conv_gn_relu(pooled, w1_ref, p1_ref, cpg1)         # conv1: C_in -> C_mid
    y2 = conv_gn_relu(y1,     w2_ref, p2_ref, cpg2)         # conv2: C_mid -> C_out
    o_ref[0] = y2


def prepare_params(params, *, groups=4):
    """Pad channels to a multiple of 8, pack weights into the (kd, C_out,
    9*C_in) bf16 matmul layout and pack bias/gamma/beta columns.  Runs once,
    outside jit (params are static)."""
    w1, w2 = params["w1"], params["w2"]
    in_ch, mid_ch = w1.shape[3], w1.shape[4]
    out_ch = w2.shape[4]
    assert mid_ch == in_ch and w2.shape[3] == mid_ch
    assert in_ch % groups == 0 and out_ch % groups == 0

    ci_p = max(8, _round_up(in_ch, 8))
    cm_p = max(8, _round_up(mid_ch, 8))
    co_p = max(8, _round_up(out_ch, 8))

    def pack_w(w, cin, cout, cin_p, cout_p):
        wp = jnp.zeros((3, 3, 3, cin_p, cout_p), jnp.float32)
        wp = wp.at[:, :, :, :cin, :cout].set(w)
        wp = jnp.transpose(wp, (0, 4, 1, 2, 3)).reshape(3, cout_p, 9 * cin_p)
        return wp.astype(jnp.bfloat16)

    def pack_p(b, g, be, c, c_p):
        p = jnp.zeros((c_p, 3), jnp.float32)
        return p.at[:c].set(jnp.stack([b, g, be], axis=1))

    return dict(
        w1m=pack_w(w1, in_ch, mid_ch, ci_p, cm_p),
        p1=pack_p(params["b1"], params["g1"], params["be1"], mid_ch, cm_p),
        w2m=pack_w(w2, mid_ch, out_ch, cm_p, co_p),
        p2=pack_p(params["b2"], params["g2"], params["be2"], out_ch, co_p),
    )


def down_forward(x_ncdhw, prep, *, out_ch, groups=4, eps=1e-5, roll_like_jnp=True):
    """down.forward: MaxPool3d((1,2,2)) + double_conv.  NCDHW in / NCDHW out."""
    N, C_in, D, H, W = x_ncdhw.shape
    assert H % 2 == 0 and W % 2 == 0, "H, W must be even for MaxPool3d((1,2,2))"
    H2, W2 = H // 2, W // 2
    dhw = D * H2 * W2

    w1m, p1, w2m, p2 = prep["w1m"], prep["p1"], prep["w2m"], prep["p2"]
    ci_p = w1m.shape[2] // 9
    cm_p = w1m.shape[1]
    co_p = w2m.shape[1]
    assert w2m.shape[2] == 9 * cm_p

    # MaxPool in XLA: kernel only sees the pooled volume (4x fewer elements),
    # cast to bf16 (halves the remaining input DMA), channels padded to 8.
    pooled = x_ncdhw.reshape(N, C_in, D, H2, 2, W2, 2).max(axis=(4, 6))
    x_flat = pooled.reshape(N, C_in, dhw).astype(jnp.bfloat16)
    if ci_p > C_in:
        x_flat = jnp.pad(x_flat, ((0, 0), (0, ci_p - C_in), (0, 0)))

    kernel = functools.partial(
        _down_kernel, vol=(D, H2, W2), groups=groups,
        cpg1=C_in // groups, cpg2=out_ch // groups, eps=eps,
        roll_like_jnp=roll_like_jnp)

    out_flat = pl.pallas_call(
        kernel,
        out_shape=jax.ShapeDtypeStruct((N, co_p, dhw), jnp.float32),
        grid=(N,),
        in_specs=[
            pl.BlockSpec((1, ci_p, dhw), lambda n: (n, 0, 0)),
            pl.BlockSpec((3, cm_p, 9 * ci_p), lambda n: (0, 0, 0)),
            pl.BlockSpec((cm_p, 3), lambda n: (0, 0)),
            pl.BlockSpec((3, co_p, 9 * cm_p), lambda n: (0, 0, 0)),
            pl.BlockSpec((co_p, 3), lambda n: (0, 0)),
        ],
        out_specs=pl.BlockSpec((1, co_p, dhw), lambda n: (n, 0, 0)),
        compiler_params=pltpu.CompilerParams(
            dimension_semantics=("parallel",),
            vmem_limit_bytes=48 * 1024 * 1024),
    )(x_flat, w1m, p1, w2m, p2)

    return out_flat[:, :out_ch, :].reshape(N, out_ch, D, H2, W2)


def init_params(key, in_ch, out_ch):
    """Deterministic synthetic init matching down(in_ch, out_ch):
    conv1: in_ch->in_ch, GN(4,in_ch); conv2: in_ch->out_ch, GN(4,out_ch)."""
    ks = jax.random.split(key, 8)
    w1 = 0.1 * jax.random.normal(ks[0], (3, 3, 3, in_ch, in_ch), jnp.float32)
    b1 = 0.1 * jax.random.normal(ks[1], (in_ch,), jnp.float32)
    g1 = 1.0 + 0.1 * jax.random.normal(ks[2], (in_ch,), jnp.float32)
    be1 = 0.1 * jax.random.normal(ks[3], (in_ch,), jnp.float32)
    w2 = 0.1 * jax.random.normal(ks[4], (3, 3, 3, in_ch, out_ch), jnp.float32)
    b2 = 0.1 * jax.random.normal(ks[5], (out_ch,), jnp.float32)
    g2 = 1.0 + 0.1 * jax.random.normal(ks[6], (out_ch,), jnp.float32)
    be2 = 0.1 * jax.random.normal(ks[7], (out_ch,), jnp.float32)
    return dict(w1=w1, b1=b1, g1=g1, be1=be1, w2=w2, b2=b2, g2=g2, be2=be2)


def _reference_forward(x_ncdhw, params, eps=1e-5, groups=4):
    """Pure-JAX reference (maxpool + lax conv + manual GroupNorm).  Conv
    operands are rounded to bf16 (f32 accumulation) to match the kernel."""
    N, C, D, H, W = x_ncdhw.shape
    x = x_ncdhw.reshape(N, C, D, H // 2, 2, W // 2, 2).max(axis=(4, 6))
    x = jnp.transpose(x, (0, 2, 3, 4, 1))                     # NDHWC

    def q(a):
        return a.astype(jnp.bfloat16).astype(jnp.float32)

    def block(xn, w, b, gamma, beta):
        y = jax.lax.conv_general_dilated(
            q(xn), q(w), window_strides=(1, 1, 1), padding="SAME",
            dimension_numbers=("NDHWC", "DHWIO", "NDHWC"))
        y = y + b
        Nn, Dd, Hh, Ww, Cc = y.shape
        cpg = Cc // groups
        yg = y.reshape(Nn, Dd, Hh, Ww, groups, cpg)
        mean = jnp.mean(yg, axis=(1, 2, 3, 5), keepdims=True)
        var = jnp.mean((yg - mean) ** 2, axis=(1, 2, 3, 5), keepdims=True)
        yg = (yg - mean) * jax.lax.rsqrt(var + eps)
        y = yg.reshape(Nn, Dd, Hh, Ww, Cc) * gamma + beta
        return jnp.maximum(y, 0.0)

    x = block(x, params["w1"], params["b1"], params["g1"], params["be1"])
    x = block(x, params["w2"], params["b2"], params["g2"], params["be2"])
    return jnp.transpose(x, (0, 4, 1, 2, 3))                   # NCDHW


if __name__ == "__main__":
    key = jax.random.PRNGKey(0)
    k_x, k_p = jax.random.split(key)

    N, in_ch, out_ch = 2, 4, 8            # channels divisible by 4 (GroupNorm)
    D, H, W = 8, 16, 16                   # after pool: (8, 8, 8) -> DHW = 512
    x = jax.random.normal(k_x, (N, in_ch, D, H, W), jnp.float32)   # NCDHW
    params = init_params(k_p, in_ch, out_ch)

    prep = prepare_params(params)              # once, outside jit (static weights)
    roll_like_jnp = _probe_roll_direction()    # eager probe of pltpu.roll direction
    down_fn = jax.jit(functools.partial(
        down_forward, out_ch=out_ch, roll_like_jnp=roll_like_jnp))

    out = jax.block_until_ready(down_fn(x, prep))
    assert out.shape == (N, out_ch, D, H // 2, W // 2), out.shape

    ref = jax.block_until_ready(_reference_forward(x, params))
    max_err = float(jnp.max(jnp.abs(out - ref)))
    assert jnp.allclose(out, ref, atol=5e-3, rtol=5e-3), max_err

    print("KERNEL_OK")
</pallas_src>

<mosaic_0001>
module attributes {stable_mosaic.version = 11 : i64} {
  func.func @k(%arg0: memref<8x128xf32, #tpu.memory_space<vmem>>, %arg1: memref<8x128xf32, #tpu.memory_space<vmem>>) attributes {dimension_semantics = [], scalar_prefetch = 0 : i64, scratch_operands = 0 : i64, tpu.core_type = #tpu.core_type<tc>} {
    %c0 = arith.constant 0 : index
    %c0_0 = arith.constant 0 : index
    %0 = vector.load %arg0[%c0, %c0_0] : memref<8x128xf32, #tpu.memory_space<vmem>>, vector<8x128xf32>
    %c1_i32 = arith.constant 1 : i32
    %1 = tpu.dynamic_rotate %0 by %c1_i32 dim 1 : vector<8x128xf32>, i32 -> vector<8x128xf32>
    %c0_1 = arith.constant 0 : index
    %c0_2 = arith.constant 0 : index
    %2 = vector.load %arg1[%c0_1, %c0_2] : memref<8x128xf32, #tpu.memory_space<vmem>>, vector<8x128xf32>
    tpu.vector_store %arg1[%c0_1, %c0_2], %1 {strides = array<i32>} : memref<8x128xf32, #tpu.memory_space<vmem>>, vector<8x128xf32>,
    return
  }
}

</mosaic_0001>

<bundles_post_ra>
// kernel: tpu_custom_call.1
= control target key start
LH: loop header
LB: loop body
LE: loop exit
PB: predicated region body
PF: predicated region fallthrough
CT: control target
= control target key end

     0   :  { %6 = vsyncpa [#allocation3], 0  ;;  %s128_s0 = inlined_call_operand.hbm [shape: f32[8,128], index: 0, kind: input, shape index: {}]   ;;  %s129_s1 = inlined_call_operand.hbm [shape: f32[8,128], index: 1, kind: output, shape index: {}]  }
   0x1   :  { %7 = vsyncpa [#allocation4], 0  ;;  %s91_s6 = smov [#allocation2]   ;;  %s43_s10 = scalar_lea.hbm %s128_s0, 128 }
   0x2   :  { %s14_s7 = sshll.u32 %s91_s6, 4  ;;  %p44_p0 = scmp.ne.s32.totalorder %s128_s0, %s43_s10  ;;  %s15_s7 = int_to_ptr.vmem [resolvable:$true] %s14_s7 }
   0x3   :  { %p47_p1 = scmp.lt.u32.totalorder %s43_s10, %s128_s0 }
   0x5   :  { %p49_p2 = pnand %p47_p1, %p44_p0 }
   0x7   :  { %52 = shalt.err (!%p49_p2)
}
   0x8   :  { %s53_s15 = scalar_lea.vmem %s15_s7, 128  ;;  %p58_p4 = scmp.lt.s32.totalorder %s15_s7, %s15_s7 }
   0x9   :  { %p54_p3 = scmp.ne.s32.totalorder %s15_s7, %s53_s15  ;;  %p59_p5 = scmp.lt.s32.totalorder %s53_s15, %s53_s15 }
   0xb   :  { %p60_p6 = por %p59_p5, %p58_p4 }
   0xd   :  { %p61_p7 = pnand %p60_p6, %p54_p3 }
   0xf   :  { %64 = shalt.err (!%p61_p7)
}
  0x10   :  { %17 = dma.hbm_to_vmem [thread:$0]  %s128_s0, 128, %s15_s7, [#allocation3]  }
  0x11   :  { %87 = dma.done.wait [#allocation3], 128  }
  0x12   :  { %88 = vsyncadd [#allocation3], 4294967168  ;;  %v21_v0 = vld [vmem:[#allocation2] sm:$0xff]  ;;  %s92_s18 = smov 1   ;;  %s93_s19 = smov [#allocation5]  }
  0x13   :  { %22 = vrot.lane.b32.xlu0 %v21_v0, %s92_s18  ;;  %s31_s20 = sshll.u32 %s93_s19, 4  ;;  %s32_s20 = int_to_ptr.vmem [resolvable:$true] %s31_s20 }
  0x14   :  { %s65_s21 = scalar_lea.vmem %s32_s20, 128  ;;  %p70_p9 = scmp.lt.s32.totalorder %s32_s20, %s32_s20 }
  0x15   :  { %p66_p8 = scmp.ne.s32.totalorder %s32_s20, %s65_s21  ;;  %p71_p10 = scmp.lt.s32.totalorder %s65_s21, %s65_s21 }
  0x17   :  { %p72_p11 = por %p71_p10, %p70_p9 }
  0x19   :  { %p73_p12 = pnand %p72_p11, %p66_p8 }
  0x85   :  { %v23_v1 = vpop.permute.xlu0 %22 }
  0x86   :  { %24 = vst [vmem:[#allocation5] sm:$0xff] %v23_v1 }
  0x87   :  { %76 = shalt.err (!%p73_p12)
}
  0x88   :  { %s77_s0 = scalar_lea.hbm %s129_s1, 128 }
  0x89   :  { %p78_p13 = scmp.ne.s32.totalorder %s129_s1, %s77_s0  ;;  %p81_p0 = scmp.lt.u32.totalorder %s77_s0, %s129_s1 }
  0x8b   :  { %p83_p1 = pnand %p81_p0, %p78_p13 }
  0x8d   :  { %86 = shalt.err (!%p83_p1)
}
  0x8e   :  { %34 = dma.vmem_to_hbm [thread:$0]  %s32_s20, 128, %s129_s1, [#allocation4]  }
  0x8f   :  { %89 = dma.done.wait [#allocation4], 128  }
  0x90   :  { %90 = vsyncadd [#allocation4], 4294967168 }
  0x91   :  { %38 = vsyncpa [#allocation3], 1 }
  0x92   :  { %39 = vsyncpa [#allocation4], 1 }

</bundles_post_ra>
